<compile_context>
chip_gen: v7x
topology: tpu7x:2x2x1
jax: 0.10.0
libtpu: 0.0.40
codegen_flags: <defaults>
</compile_context>

<pallas_src>
import jax
import jax.numpy as jnp
from jax import lax
from jax.experimental import pallas as pl
from jax.experimental.pallas import tpu as pltpu

LN_EPS = 1e-5


def _round_up(x, m):
    return ((x + m - 1) // m) * m


def _cdiv(a, b):
    return (a + b - 1) // b


def _patch_expand_kernel(x_ref, wt_ref, gm_ref, eg_ref, beta_ref, y_ref):
    # x_ref:    (1, dim, ts)      NCHW tile: channels on sublanes, spatial on lanes
    # wt_ref:   (out_dim, dim)    nn.Linear weight, PyTorch (out, in) layout
    # gm_ref:   (gp, out_dim)     group-averaging matrix (1/c on members; zero-padded rows)
    # eg_ref:   (out_dim, gp)     one-hot group expansion with LayerNorm gamma folded in
    # beta_ref: (out_dim, 1)      LayerNorm beta per expanded channel
    # y_ref:    (1, out_dim, ts)  expanded + normalized tile, channel-major
    x = x_ref[0]                                                      # (dim, ts)
    y = jnp.dot(wt_ref[...], x, preferred_element_type=jnp.float32)   # (out_dim, ts)
    gm = gm_ref[...]
    m1 = jnp.dot(gm, y, preferred_element_type=jnp.float32)           # (gp, ts) E[y]
    m2 = jnp.dot(gm, y * y, preferred_element_type=jnp.float32)       # (gp, ts) E[y^2]
    # Padded group rows evaluate to rsqrt(LN_EPS) (finite, harmless) and are
    # multiplied by zero columns of eg below -- do not "fix" with a mask.
    inv = lax.rsqrt(m2 - m1 * m1 + LN_EPS)                            # EUP rsqrt
    eg = eg_ref[...]
    scale = jnp.dot(eg, inv, preferred_element_type=jnp.float32)      # gamma * inv
    shift = jnp.dot(eg, m1 * inv, preferred_element_type=jnp.float32)  # gamma * mean * inv
    y_ref[0] = (y * scale - shift + beta_ref[...]).astype(y_ref.dtype)


def _choose_spatial_tile(hw, batch, ts_hint):
    if hw <= 128:
        return hw                      # block last dim == full array dim (allowed)
    ts = max(128, min(_round_up(ts_hint, 128), (hw // 128) * 128))
    # Prefer >= 4 total grid steps so v7x's two TensorCores stay balanced.
    while batch * _cdiv(hw, ts) < 4 and ts > 128:
        ts = max(128, _round_up(ts // 2, 128))
    return ts


def patch_expand(x_nchw, w_expand, gamma, beta, *, dim_scale=2, ts_hint=8192):
    """PatchExpand forward (Linear expand -> pixel shuffle -> LayerNorm).

    x_nchw:     (B, dim, H, W) float32
    w_expand:   (expand_dim*dim, dim) PyTorch nn.Linear weight (out, in), no bias
    gamma/beta: (expand_dim*dim // dim_scale**2,) LayerNorm affine
    ts_hint:    spatial positions per grid step.  Sweet spots:
                v5e 4096-8192, v6e 8192-16384, v7x 16384-32768.
    returns:    (B, expand_dim*dim // dim_scale**2, H*dim_scale, W*dim_scale)
    """
    B, dim, H, W = x_nchw.shape
    out_dim, in_dim = w_expand.shape
    assert in_dim == dim
    groups = dim_scale * dim_scale
    c = out_dim // groups
    gp = max(groups, 8)                # pad group axis to a full sublane tile

    hw = H * W
    ts = _choose_spatial_tile(hw, B, ts_hint)
    n_tiles = _cdiv(hw, ts)

    f32 = jnp.float32
    # Constants, built once in channel-major ("transposed") space.
    group_of = jnp.arange(out_dim) // c                                   # (out_dim,)
    gm = (jnp.arange(gp)[:, None] == group_of[None, :]).astype(f32) / c   # (gp, out_dim)
    gamma_full = jnp.tile(gamma.astype(f32), groups)                      # gamma[l % c]
    eg = (group_of[:, None] == jnp.arange(gp)[None, :]).astype(f32) * gamma_full[:, None]
    beta_col = jnp.tile(beta.astype(f32), groups).reshape(out_dim, 1)
    wt = w_expand.astype(f32)                                             # (out_dim, dim)

    # Free view: NCHW -> (B, dim, H*W).  The kernel contracts the channel axis
    # in place, so no wrapper-side NCHW->NHWC transpose pass is needed.
    x3d = x_nchw.reshape(B, dim, hw)

    # ~384 B of HBM traffic per spatial position for dim=32 (96 f32 values).
    cost = pl.CostEstimate(
        flops=B * hw * (2 * dim * out_dim + 8 * gp * out_dim),
        transcendentals=B * hw * gp,
        bytes_accessed=B * hw * (dim + out_dim) * 4,
    )

    yp = pl.pallas_call(
        _patch_expand_kernel,
        out_shape=jax.ShapeDtypeStruct((B, out_dim, hw), x_nchw.dtype),
        grid=(B, n_tiles),
        in_specs=[
            pl.BlockSpec((1, dim, ts), lambda b, j: (b, 0, j)),
            # Constant operands (< 64 KiB padded); double-buffering them is
            # free enough that pl.Buffered(1) is not worth the plumbing.
            pl.BlockSpec((out_dim, dim), lambda b, j: (0, 0)),
            pl.BlockSpec((gp, out_dim), lambda b, j: (0, 0)),
            pl.BlockSpec((out_dim, gp), lambda b, j: (0, 0)),
            pl.BlockSpec((out_dim, 1), lambda b, j: (0, 0)),
        ],
        out_specs=pl.BlockSpec((1, out_dim, ts), lambda b, j: (b, 0, j)),
        compiler_params=pltpu.CompilerParams(
            dimension_semantics=("parallel", "parallel"),
            vmem_limit_bytes=48 * 1024 * 1024,
        ),
        cost_estimate=cost,
    )(x3d, wt, gm, eg, beta_col)

    # Pixel shuffle + NCHW output in a single XLA transpose.
    # TODO(synk): if the surrounding model stays channel-major, this final
    # transpose can be folded into the consumer and dropped entirely.
    y = yp.reshape(B, dim_scale, dim_scale, c, H, W)
    y = jnp.transpose(y, (0, 3, 4, 1, 5, 2))
    return y.reshape(B, c, H * dim_scale, W * dim_scale)


def _reference(x_nchw, w_expand, gamma, beta, dim_scale=2):
    # Pure-JAX reference mirroring the PyTorch forward.
    B, dim, H, W = x_nchw.shape
    x = jnp.transpose(x_nchw, (0, 2, 3, 1))
    x = jnp.einsum("bhwc,oc->bhwo", x, w_expand)
    out_dim = w_expand.shape[0]
    c = out_dim // (dim_scale ** 2)
    x = x.reshape(B, H, W, dim_scale, dim_scale, c)
    x = jnp.transpose(x, (0, 1, 3, 2, 4, 5)).reshape(
        B, H * dim_scale, W * dim_scale, c)
    mean = jnp.mean(x, axis=-1, keepdims=True)
    var = jnp.mean(jnp.square(x - mean), axis=-1, keepdims=True)
    x = (x - mean) * lax.rsqrt(var + LN_EPS) * gamma + beta
    return jnp.transpose(x, (0, 3, 1, 2))


if __name__ == "__main__":
    key = jax.random.PRNGKey(0)
    B, dim, H, W = 2, 32, 16, 16
    dim_scale, expand_dim = 2, 2
    out_dim = expand_dim * dim
    c = out_dim // dim_scale ** 2

    kx, kw, kg, kb = jax.random.split(key, 4)
    x = jax.random.normal(kx, (B, dim, H, W), dtype=jnp.float32)
    # nn.Linear weight (out_features, in_features), no bias
    w_expand = jax.random.normal(kw, (out_dim, dim), dtype=jnp.float32) * 0.05
    # LayerNorm affine (deterministic, non-trivial)
    gamma = 1.0 + 0.1 * jax.random.normal(kg, (c,), dtype=jnp.float32)
    beta = 0.1 * jax.random.normal(kb, (c,), dtype=jnp.float32)

    out = patch_expand(x, w_expand, gamma, beta, dim_scale=dim_scale)
    out = jax.block_until_ready(out)

    ref = _reference(x, w_expand, gamma, beta, dim_scale=dim_scale)
    assert out.shape == (B, c, H * dim_scale, W * dim_scale), out.shape
    max_err = float(jnp.max(jnp.abs(out - ref)))
    assert jnp.allclose(out, ref, atol=1e-4, rtol=1e-4), max_err

    print("KERNEL_OK")
</pallas_src>

<mosaic_0001>
module attributes {stable_mosaic.version = 11 : i64} {
  func.func @_patch_expand_kernel(%arg0: i32, %arg1: i32, %arg2: memref<1x32x128xf32, #tpu.memory_space<vmem>>, %arg3: memref<64x32xf32, #tpu.memory_space<vmem>>, %arg4: memref<8x64xf32, #tpu.memory_space<vmem>>, %arg5: memref<64x8xf32, #tpu.memory_space<vmem>>, %arg6: memref<64x1xf32, #tpu.memory_space<vmem>>, %arg7: memref<1x64x128xf32, #tpu.memory_space<vmem>>) attributes {dimension_semantics = [#tpu.dimension_semantics<parallel>, #tpu.dimension_semantics<parallel>], iteration_bounds = array<i64: 2, 2>, scalar_prefetch = 0 : i64, scratch_operands = 0 : i64, tpu.core_type = #tpu.core_type<tc>, window_params = [{transform_indices = @transform_0, window_bounds = array<i64: 1, 32, 128>}, {pipeline_mode = #tpu.pipeline_mode<synchronous>, transform_indices = @transform_1, window_bounds = array<i64: 64, 32>}, {pipeline_mode = #tpu.pipeline_mode<synchronous>, transform_indices = @transform_2, window_bounds = array<i64: 8, 64>}, {pipeline_mode = #tpu.pipeline_mode<synchronous>, transform_indices = @transform_3, window_bounds = array<i64: 64, 8>}, {pipeline_mode = #tpu.pipeline_mode<synchronous>, transform_indices = @transform_4, window_bounds = array<i64: 64, 1>}, {transform_indices = @transform_5, window_bounds = array<i64: 1, 64, 128>}]} {
    %c0 = arith.constant 0 : index
    %c0_0 = arith.constant 0 : index
    %c0_1 = arith.constant 0 : index
    %0 = vector.load %arg2[%c0, %c0_0, %c0_1] : memref<1x32x128xf32, #tpu.memory_space<vmem>>, vector<1x32x128xf32>
    %1 = vector.shape_cast %0 : vector<1x32x128xf32> to vector<32x128xf32>
    %c0_2 = arith.constant 0 : index
    %c0_3 = arith.constant 0 : index
    %2 = vector.load %arg3[%c0_2, %c0_3] : memref<64x32xf32, #tpu.memory_space<vmem>>, vector<64x32xf32>
    %cst = arith.constant dense<0.000000e+00> : vector<64x128xf32>
    %3 = tpu.matmul %2, %1, %cst {dimension_numbers = #tpu.dot_dimension_numbers<[1], [0], [0], [1], [0, 0, 1, 1], [], []>} : vector<64x32xf32>, vector<32x128xf32>, vector<64x128xf32> -> vector<64x128xf32>
    %c0_4 = arith.constant 0 : index
    %c0_5 = arith.constant 0 : index
    %4 = vector.load %arg4[%c0_4, %c0_5] : memref<8x64xf32, #tpu.memory_space<vmem>>, vector<8x64xf32>
    %cst_6 = arith.constant dense<0.000000e+00> : vector<8x128xf32>
    %5 = tpu.matmul %4, %3, %cst_6 {dimension_numbers = #tpu.dot_dimension_numbers<[1], [0], [0], [1], [0, 0, 1, 1], [], []>} : vector<8x64xf32>, vector<64x128xf32>, vector<8x128xf32> -> vector<8x128xf32>
    %6 = arith.mulf %3, %3 : vector<64x128xf32>
    %cst_7 = arith.constant dense<0.000000e+00> : vector<8x128xf32>
    %7 = tpu.matmul %4, %6, %cst_7 {dimension_numbers = #tpu.dot_dimension_numbers<[1], [0], [0], [1], [0, 0, 1, 1], [], []>} : vector<8x64xf32>, vector<64x128xf32>, vector<8x128xf32> -> vector<8x128xf32>
    %8 = arith.mulf %5, %5 : vector<8x128xf32>
    %9 = arith.subf %7, %8 : vector<8x128xf32>
    %cst_8 = arith.constant 9.99999974E-6 : f32
    %10 = vector.broadcast %cst_8 : f32 to vector<8x128xf32>
    %11 = arith.addf %9, %10 : vector<8x128xf32>
    %12 = math.rsqrt %11 : vector<8x128xf32>
    %c0_9 = arith.constant 0 : index
    %c0_10 = arith.constant 0 : index
    %13 = vector.load %arg5[%c0_9, %c0_10] : memref<64x8xf32, #tpu.memory_space<vmem>>, vector<64x8xf32>
    %cst_11 = arith.constant dense<0.000000e+00> : vector<64x128xf32>
    %14 = tpu.matmul %13, %12, %cst_11 {dimension_numbers = #tpu.dot_dimension_numbers<[1], [0], [0], [1], [0, 0, 1, 1], [], []>} : vector<64x8xf32>, vector<8x128xf32>, vector<64x128xf32> -> vector<64x128xf32>
    %15 = arith.mulf %5, %12 : vector<8x128xf32>
    %cst_12 = arith.constant dense<0.000000e+00> : vector<64x128xf32>
    %16 = tpu.matmul %13, %15, %cst_12 {dimension_numbers = #tpu.dot_dimension_numbers<[1], [0], [0], [1], [0, 0, 1, 1], [], []>} : vector<64x8xf32>, vector<8x128xf32>, vector<64x128xf32> -> vector<64x128xf32>
    %17 = arith.mulf %3, %14 : vector<64x128xf32>
    %18 = arith.subf %17, %16 : vector<64x128xf32>
    %c0_13 = arith.constant 0 : index
    %c0_14 = arith.constant 0 : index
    %19 = vector.load %arg6[%c0_13, %c0_14] : memref<64x1xf32, #tpu.memory_space<vmem>>, vector<64x1xf32>
    %20 = vector.broadcast %19 : vector<64x1xf32> to vector<64x128xf32>
    %21 = arith.addf %18, %20 : vector<64x128xf32>
    %c0_15 = arith.constant 0 : index
    %c0_16 = arith.constant 0 : index
    %c0_17 = arith.constant 0 : index
    %22 = vector.load %arg7[%c0_15, %c0_16, %c0_17] : memref<1x64x128xf32, #tpu.memory_space<vmem>>, vector<1x64x128xf32>
    %23 = vector.shape_cast %22 : vector<1x64x128xf32> to vector<64x128xf32>
    %24 = vector.shape_cast %21 : vector<64x128xf32> to vector<1x64x128xf32>
    tpu.vector_store %arg7[%c0_15, %c0_16, %c0_17], %24 {strides = array<i32>} : memref<1x64x128xf32, #tpu.memory_space<vmem>>, vector<1x64x128xf32>,
    return
  }
  func.func @transform_0(%arg0: i32, %arg1: i32) -> (i32, i32, i32) {
    %c0_i32 = arith.constant 0 : i32
    %c0_i32_0 = arith.constant 0 : i32
    return %arg0, %c0_i32, %arg1 : i32, i32, i32
  }
  func.func @transform_1(%arg0: i32, %arg1: i32) -> (i32, i32) {
    %c0_i32 = arith.constant 0 : i32
    %c0_i32_0 = arith.constant 0 : i32
    %c0_i32_1 = arith.constant 0 : i32
    return %c0_i32, %c0_i32_0 : i32, i32
  }
  func.func @transform_2(%arg0: i32, %arg1: i32) -> (i32, i32) {
    %c0_i32 = arith.constant 0 : i32
    %c0_i32_0 = arith.constant 0 : i32
    %c0_i32_1 = arith.constant 0 : i32
    return %c0_i32, %c0_i32_0 : i32, i32
  }
  func.func @transform_3(%arg0: i32, %arg1: i32) -> (i32, i32) {
    %c0_i32 = arith.constant 0 : i32
    %c0_i32_0 = arith.constant 0 : i32
    %c0_i32_1 = arith.constant 0 : i32
    return %c0_i32, %c0_i32_0 : i32, i32
  }
  func.func @transform_4(%arg0: i32, %arg1: i32) -> (i32, i32) {
    %c0_i32 = arith.constant 0 : i32
    %c0_i32_0 = arith.constant 0 : i32
    %c0_i32_1 = arith.constant 0 : i32
    return %c0_i32, %c0_i32_0 : i32, i32
  }
  func.func @transform_5(%arg0: i32, %arg1: i32) -> (i32, i32, i32) {
    %c0_i32 = arith.constant 0 : i32
    %c0_i32_0 = arith.constant 0 : i32
    return %arg0, %c0_i32, %arg1 : i32, i32, i32
  }
}

</mosaic_0001>

<bundles_post_ra>
// kernel: tpu_custom_call.1
= control target key start
LH: loop header
LB: loop body
LE: loop exit
PB: predicated region body
PF: predicated region fallthrough
CT: control target
= control target key end

     0   :  { %10 = vsyncpa [#allocation4], 0  ;;  %s1742_s0 = inlined_call_operand.vmem [shape: f32[2,32,256], index: 0, kind: input, shape index: {}]   ;;  %s1743_s1 = inlined_call_operand.vmem [shape: f32[64,32], index: 1, kind: input, shape index: {}]   ;;  %s1744_s2 = inlined_call_operand.vmem [shape: f32[8,64], index: 2, kind: input, shape index: {}]   ;;  %s1745_s3 = inlined_call_operand.vmem [shape: f32[64,8], index: 3, kind: input, shape index: {}]   ;;  %s1746_s4 = inlined_call_operand.vmem [shape: f32[64,1], index: 4, kind: input, shape index: {}]   ;;  %s1747_s5 = inlined_call_operand.hbm [shape: f32[2,64,256], index: 5, kind: output, shape index: {}]  }
   0x1   :  { %12 = vsyncpa [#allocation4 + $0x1], 0  ;;  %s1433_s18 = smov 0   ;;  %s1435_s19 = smov 0  }
   0x2   :  { %s1437_s20 = smov 0   ;;  %s1439_s21 = smov 0  }
   0x3   :  { %s1441_s22 = smov 0   ;;  %s1443_s23 = smov 0  }
   0x4   :  { %s1445_s24 = smov 0   ;;  %s1447_s25 = smov 0  }
   0x5 LB: > { %s1008_s26 = sadd.s32 4294967295, %s1393_s25   ;;  %s1009_s27 = sadd.s32 4294967294, %s1393_s25   ;;  %s1393_s25 = sphi %s1447_s25, %s18_s25   ;;  %s1389_s24 = sphi %s1445_s24, %s1757_s24   ;;  %s1385_s23 = sphi %s1443_s23, %s1756_s23   ;;  %s1381_s22 = sphi %s1441_s22, %s1755_s22   ;;  %s1377_s21 = sphi %s1439_s21, %s1754_s21   ;;  %s1373_s20 = sphi %s1437_s20, %s1753_s20   ;;  %s1369_s19 = sphi %s1435_s19, %s1752_s19   ;;  %s1365_s18 = sphi %s1433_s18, %s1751_s18  }
   0x6   : > { %s27_s28 = sadd.s32 1, %s1385_s23  ;;  %s30_s29 = sadd.s32 1, %s1389_s24 }
   0x7   : > { %p28_p0 = scmp.ge.s32.totalorder %s27_s28, 2  ;;  %p46_p1 = scmp.ne.s32.totalorder %s1373_s20, %s1369_s19 }
   0x8   : > { %p47_p2 = scmp.eq.s32.totalorder %s1393_s25, 0  ;;  %p162_p5 = scmp.eq.s32.totalorder %s1008_s26, 3 }
   0x9   : > { %s1759_s28 = smov (%p28_p0, %s27_s28), 0  ;;  %s1761_s29 = smov (!%p28_p0, %s30_s29), %s1389_s24 }
   0xa   : > { %s35_s30 = ssub.s32 %s1385_s23, %s1759_s28  ;;  %p1485_p3 = por %p47_p2, %p46_p1 }
   0xb   : > { %p32_p4 = scmp.ge.s32.totalorder %s1761_s29, 2  ;;  %p167_p6 = scmp.ne.s32.totalorder %s1369_s19, %s1365_s18 }
   0xc   : > { %p168_p7 = scmp.eq.s32.totalorder %s1009_s27, 3  ;;  %p1493_p8 = por %p162_p5, %p46_p1 }
   0xd   : > { %s1763_s29 = smov (%p32_p4, %s1761_s29), 0  ;;  %s39_s11 = sadd.s32 1, %s1373_s20 }
   0xe   : > { %p1497_p9 = por %p168_p7, %p167_p6  ;;  %s34_s9 = ssub.s32 %s1389_s24, %s1763_s29 }
   0xf   : > { %s36_s10 = sor.u32 %s35_s30, %s34_s9  ;;  %p1011_p11 = scmp.ge.s32.totalorder %s1393_s25, 4 }
  0x10   : > { %p37_p10 = scmp.eq.s32.totalorder %s36_s10, 0 }
  0x11   : > { %196 = sbr.rel (%p1011_p11) target bundleno = 32 (0x20), region = 32 }
  0x12   : > { %s1505_s12 = scalar_select %p37_p10, %s1373_s20, %s39_s11  }
  0x18   : > { %199 = sbr.rel (!%p1485_p3) target bundleno = 32 (0x20), region = 36  ;;  %s201_s13 = sand.u32 (%p1485_p3), 1, %s1373_s20  }
  0x19   : > { %s1013_s14 = sshll.u32 (%p1485_p3), %s1389_s24, 3  ;;  %s1012_s15 = sshll.u32 (%p1485_p3), %s201_s13, 5 }
  0x1a   : > { %s205_s16 = sadd.s32 (%p1485_p3), %s1385_s23, %s1013_s14  ;;  %s203_s9 = scalar_lea.vmem (%p1485_p3), [#allocation2], %s1012_s15 }
  0x1b   : > { %s1014_s17 = sshll.u32 (%p1485_p3), %s205_s16, 3 }
  0x1c   : > { %s207_s30 = scalar_lea.vmem (%p1485_p3), %s1742_s0, %s1014_s17 }
  0x1d   : > { %v241_v0 = vld [vmem:[%s207_s30] sm:$0xff] (%p1485_p3)  ;;  %v243_v1 = vld [vmem:[%s207_s30 + $0x10] sm:$0xff] (%p1485_p3) }
  0x1e   : > { %v245_v2 = vld [vmem:[%s207_s30 + $0x20] sm:$0xff] (%p1485_p3)  ;;  %242 = vst [vmem:[%s203_s9] sm:$0xff] (%p1485_p3), %v241_v0  ;;  %244 = vst [vmem:[%s203_s9 + $0x8] sm:$0xff] (%p1485_p3), %v243_v1  ;;  %v247_v3 = vld [vmem:[%s207_s30 + $0x30] sm:$0xff] (%p1485_p3) }
  0x1f   : > { %246 = vst [vmem:[%s203_s9 + $0x10] sm:$0xff] %v245_v2  ;;  %248 = vst [vmem:[%s203_s9 + $0x18] sm:$0xff] %v247_v3 }
  0x20 PF: > { %p1015_p12 = scmp.ge.s32.totalorder %s1393_s25, 1  ;;  %p253_p13 = scmp.lt.s32.totalorder %s1393_s25, 5 }
  0x22   : > { %p254_p0 = pnand %p1015_p12, %p253_p13 }
  0x23   : > { %s1519_s6 = sand.u32 (!%p254_p0), 1, %s1369_s19   ;;  %v291_v4 = vld [vmem:[%s1743_s1] sm:$0xff] (!%p254_p0)  ;;  %vm299_vm0 = vcmask (!%p254_p0), 261120   ;;  %v292_v11 = vld [vmem:[%s1743_s1 + $0x8] sm:$0xff] (!%p254_p0)  ;;  %v293_v12 = vld [vmem:[%s1743_s1 + $0x10] sm:$0xff] (!%p254_p0)  ;;  %v1395_v18 = vmov (!%p254_p0), 0.0|0.0  }
  0x24   : > { %257 = sbr.rel (%p254_p0) target bundleno = 759 (0x2f7), region = 74  ;;  %s1016_s13 = sshll.u32 (!%p254_p0), %s1519_s6, 5  ;;  %1105 = vmatprep.mubr.msk.f32.mxu0 (!%p254_p0), %vm299_vm0, %v291_v4  ;;  %v294_v13 = vld [vmem:[%s1743_s1 + $0x18] sm:$0xff] (!%p254_p0)  ;;  %v295_v14 = vld [vmem:[%s1743_s1 + $0x20] sm:$0xff] (!%p254_p0)  ;;  %v296_v15 = vld [vmem:[%s1743_s1 + $0x28] sm:$0xff] (!%p254_p0)  ;;  %1191 = vmatprep.subr.bf16.mxu1 (!%p254_p0), %v1395_v18  ;;  %vm1396_vm1 = vmmov (!%p254_p0), 0  }
  0x25   : > { %s262_s14 = scalar_lea.vmem (!%p254_p0), [#allocation2], %s1016_s13  ;;  %v297_v16 = vld [vmem:[%s1743_s1 + $0x30] sm:$0xff] (!%p254_p0)  ;;  %v298_v17 = vld [vmem:[%s1743_s1 + $0x38] sm:$0xff] (!%p254_p0)  ;;  %v1397_v19 = vmov (!%p254_p0), 0.0   ;;  %v429_v44 = vld [vmem:[%s1744_s2] sm:$0xff] (!%p254_p0)  ;;  %vm430_vm2 = vcmask (!%p254_p0), 523264  }
  0x26   : > { %v287_v5 = vld [vmem:[%s262_s14] sm:$0xff] (!%p254_p0)  ;;  %v288_v6 = vld [vmem:[%s262_s14 + $0x8] sm:$0xff] (!%p254_p0)  ;;  %v289_v7 = vld [vmem:[%s262_s14 + $0x10] sm:$0xff] (!%p254_p0)  ;;  %1133 = vmatprep.mubr.msk.f32.mxu1 (!%p254_p0), %vm1396_vm1, %v1397_v19  ;;  %vm594_vm3 = vcmask (!%p254_p0), 64512   ;;  %v1398_v48 = vmov (!%p254_p0), 0   ;;  %s1017_s27 = sshll.u32 (!%p254_p0), %s1519_s6, 6 }
  0x27   : > { %v1183_v8 = vpack.c.bf16 (!%p254_p0), %v288_v6, %v287_v5  ;;  %v290_v9 = vld [vmem:[%s262_s14 + $0x18] sm:$0xff] (!%p254_p0)  ;;  %v586_v45 = vld [vmem:[%s1745_s3] sm:$0xff] (!%p254_p0)  ;;  %v848_v46 = vld [vmem:[%s1746_s4 + $0x10] sm:$0xff] (!%p254_p0)  ;;  %1296 = vset.pattern.permute.xlu1 (!%p254_p0), %v1398_v48  ;;  %1295 = vset.pattern.permute.xlu0 (!%p254_p0), %v1398_v48  ;;  %s1666_s30 = scalar_lea.vmem (!%p254_p0), [#allocation3], %s1017_s27  ;;  %s1045_s9 = sshll.u32 (!%p254_p0), %s1381_s22, 4 }
  0x28   : > { %v1187_v10 = vpack.c.bf16 (!%p254_p0), %v290_v9, %v289_v7  ;;  %v846_v47 = vld [vmem:[%s1746_s4] sm:$0xff] (!%p254_p0)  ;;  %866 = vperm.xlu1 (!%p254_p0), %1296, %v848_v46   ;;  %v849_v49 = vld [vmem:[%s1746_s4 + $0x18] sm:$0xff] (!%p254_p0)  ;;  %v847_v50 = vld [vmem:[%s1746_s4 + $0x8] sm:$0xff] (!%p254_p0)  ;;  %s922_s10 = sadd.s32 (!%p254_p0), %s1377_s21, %s1045_s9  ;;  %s925_s22 = sshll.u32 (!%p254_p0), %s1666_s30, 4  ;;  %s1681_s22 = int_to_ptr.vmem [resolvable:$true] %s925_s22 }
  0x29   : > { %1184 = vmatprep.subr.bf16.mxu0 (!%p254_p0), %v1183_v8  ;;  %856 = vperm.xlu0 (!%p254_p0), %1295, %v846_v47   ;;  %v851_v51 = vld [vmem:[%s1746_s4 + $0x28] sm:$0xff] (!%p254_p0)  ;;  %v850_v52 = vld [vmem:[%s1746_s4 + $0x20] sm:$0xff] (!%p254_p0)  ;;  %v853_v53 = vld [vmem:[%s1746_s4 + $0x38] sm:$0xff] (!%p254_p0)  ;;  %s1046_s11 = sshll.u32 (!%p254_p0), %s922_s10, 7  ;;  %s911_s15 = scalar_lea.sflag (!%p254_p0), [#allocation4], %s1519_s6 }
  0x2a   : > { %1186 = vmatpush3.bf16.msra.mxu0 (!%p254_p0), %v1183_v8  ;;  %v852_v54 = vld [vmem:[%s1746_s4 + $0x30] sm:$0xff] (!%p254_p0)  ;;  %v587_v63 = vld [vmem:[%s1745_s3 + $0x8] sm:$0xff] (!%p254_p0)  ;;  %v589_v2 = vld [vmem:[%s1745_s3 + $0x18] sm:$0xff] (!%p254_p0)  ;;  %s1686_s14 = scalar_lea.hbm (!%p254_p0), %s1747_s5, %s1046_s11  ;;  %s1299_s16 = scalar_lea.vmem (!%p254_p0), %s1681_s22, 1024 }
  0x2b   : > { %1188 = vmatprep.subr.bf16.mxu0 %v1187_v10  ;;  %v588_v1 = vld [vmem:[%s1745_s3 + $0x10] sm:$0xff]  ;;  %v590_v3 = vld [vmem:[%s1745_s3 + $0x20] sm:$0xff]  ;;  %v591_v4 = vld [vmem:[%s1745_s3 + $0x28] sm:$0xff]  ;;  %p1300_p1 = scmp.ne.s32.totalorder %s1681_s22, %s1299_s16  ;;  %s1399_s17 = smov [#allocation3]  }
  0x2c   : > { %871 = vperm.xlu1 %1296, %v849_v49   ;;  %v592_v5 = vld [vmem:[%s1745_s3 + $0x30] sm:$0xff]  ;;  %v593_v6 = vld [vmem:[%s1745_s3 + $0x38] sm:$0xff]  ;;  %s1303_s26 = sshll.u32 %s1399_s17, 4  ;;  %s1304_s26 = int_to_ptr.vmem [resolvable:$false] %s1303_s26 }
  0x2d   : > { %861 = vperm.xlu0 %1295, %v847_v50   ;;  %p1301_p2 = pnand %p1300_p1, %p1493_p8  ;;  %s1305_s27 = scalar_lea.vmem %s1304_s26, 2048 }
  0x2e   : > { %1190 = vmatpush3.bf16.msra.mxu0 %v1187_v10  ;;  %p1306_p4 = scmp.lt.s32.totalorder %s1681_s22, %s1304_s26  ;;  %p1307_p5 = scmp.lt.s32.totalorder %s1305_s27, %s1299_s16 }
  0x2f   : > { %1203 = vmatprep.subr.bf16.mxu0 %v1395_v18  ;;  %p1302_p3 = pneg %p1301_p2 }
  0x30   : > { %881 = vperm.xlu1 %1296, %v851_v51   ;;  %p1308_p6 = por %p1307_p5, %p1306_p4 }
  0x31   : > { %1106 = vmatmul.mubr.msk.f32.vlgmr.msra.gmra.mrb[0].mxu0 %vm299_vm0, %v292_v11  ;;  %876 = vperm.xlu0 %1295, %v850_v52  }
  0x32   : > { %1108 = vmatprep.mubr.msk.f32.mxu0 %vm299_vm0, %v293_v12  ;;  %p1309_p7 = pnand %p1308_p6, %p1302_p3 }
  0x34   : > { %891 = vperm.xlu1 %1296, %v853_v53  }
  0x35   : > { %1109 = vmatmul.mubr.msk.f32.gmra.mrb[2].mxu0 %vm299_vm0, %v294_v13  ;;  %886 = vperm.xlu0 %1295, %v852_v54  }
  0x36   : > { %1111 = vmatprep.mubr.msk.f32.mxu0 %vm299_vm0, %v295_v14 }
  0x39   : > { %1112 = vmatmul.mubr.msk.f32.gmra.mrb[4].mxu0 %vm299_vm0, %v296_v15 }
  0x3a   : > { %1114 = vmatprep.mubr.msk.f32.mxu0 %vm299_vm0, %v297_v16 }
  0x3d   : > { %1115 = vmatmul.mubr.msk.f32.gmra.mrb[6].mxu0 %vm299_vm0, %v298_v17 }
  0x3e   : > { %1152 = vmatprep.mubr.msk.f32.mxu0 %vm1396_vm1, %v1397_v19 }
  0xa7   : > { %v867_v8 = vpop.permute.xlu1 %866 }
  0xa8   : > { %v857_v7 = vpop.permute.xlu0 %856 }
  0xac   : > { %v862_v16 = vpop.permute.xlu0 %861 }
 0x104   : > { %v1554_v20 = vpop.f32.mrb[0].mxu0 }
 0x105   : > { %v505_v21 = vmul.f32 %v1554_v20, %v1554_v20  ;;  %v1558_v22 = vpop.f32.mrb[1].mxu0 }
 0x106   : > { %v504_v23 = vmul.f32 %v1558_v22, %v1558_v22  ;;  %v1192_v24 = vpack.c.bf16 %v1554_v20, %v1558_v22 }
 0x108   : > { %v1204_v25 = vpack.c.bf16 %v505_v21, %v504_v23  ;;  %v1564_v26 = vpop.f32.mrb[2].mxu0  ;;  %1193 = vmatpush3.bf16.msra.mxu1 %v1192_v24  ;;  %v872_v24 = vpop.permute.xlu1 %871 }
 0x109   : > { %v507_v27 = vmul.f32 %v1564_v26, %v1564_v26  ;;  %v1568_v28 = vpop.f32.mrb[3].mxu0  ;;  %1194 = vmatprep.subr.bf16.mxu1 %v1395_v18 }
 0x10a   : > { %v1195_v29 = vpack.c.bf16 %v1564_v26, %v1568_v28  ;;  %v506_v30 = vmul.f32 %v1568_v28, %v1568_v28  ;;  %1205 = vmatpush3.bf16.msra.mxu0 %v1204_v25 }
 0x10b   : > { %1206 = vmatprep.subr.bf16.mxu0 %v1395_v18 }
 0x10c   : > { %v1207_v31 = vpack.c.bf16 %v507_v27, %v506_v30  ;;  %v1574_v32 = vpop.f32.mrb[4].mxu0  ;;  %1196 = vmatpush3.bf16.msra.mxu1 %v1195_v29 }
 0x10d   : > { %v509_v33 = vmul.f32 %v1574_v32, %v1574_v32  ;;  %v1578_v34 = vpop.f32.mrb[5].mxu0  ;;  %1197 = vmatprep.subr.bf16.mxu1 %v1395_v18 }
 0x10e   : > { %v1198_v35 = vpack.c.bf16 %v1574_v32, %v1578_v34  ;;  %v508_v36 = vmul.f32 %v1578_v34, %v1578_v34  ;;  %1208 = vmatpush3.bf16.msra.mxu0 %v1207_v31 }
 0x10f   : > { %1209 = vmatprep.subr.bf16.mxu0 %v1395_v18 }
 0x110   : > { %v1210_v37 = vpack.c.bf16 %v509_v33, %v508_v36  ;;  %v1584_v38 = vpop.f32.mrb[6].mxu0  ;;  %1199 = vmatpush3.bf16.msra.mxu1 %v1198_v35 }
 0x111   : > { %v511_v39 = vmul.f32 %v1584_v38, %v1584_v38  ;;  %v1588_v40 = vpop.f32.mrb[7].mxu0  ;;  %1200 = vmatprep.subr.bf16.mxu1 %v1395_v18 }
 0x112   : > { %v1201_v41 = vpack.c.bf16 %v1584_v38, %v1588_v40  ;;  %v510_v42 = vmul.f32 %v1588_v40, %v1588_v40  ;;  %1211 = vmatpush3.bf16.msra.mxu0 %v1210_v37 }
 0x113   : > { %1212 = vmatprep.subr.bf16.mxu0 %v1395_v18 }
 0x114   : > { %v1213_v43 = vpack.c.bf16 %v511_v39, %v510_v42  ;;  %1202 = vmatpush3.bf16.msra.mxu1 %v1201_v41  ;;  %v882_v42 = vpop.permute.xlu1 %881 }
 0x116   : > { %1214 = vmatpush3.bf16.msra.mxu0 %v1213_v43 }
 0x117   : > { %1134 = vmatmul.mubr.msk.f32.vlgmr.msra.gmra.mrb[0].mxu1 %vm430_vm2, %v429_v44 }
 0x118   : > { %1157 = vmatprep.mubr.msk.f32.mxu1 %vm594_vm3, %v586_v45 }
 0x119   : > { %1153 = vmatmul.mubr.msk.f32.vlgmr.msra.gmra.mrb[8].mxu0 %vm430_vm2, %v429_v44 }
 0x11a   : > { %1171 = vmatprep.mubr.msk.f32.mxu0 %vm594_vm3, %v586_v45  ;;  %v877_v45 = vpop.permute.xlu0 %876 }
 0x11e   : > { %v887_v53 = vpop.permute.xlu0 %886 }
 0x1ea   : > { %v500_v55 = vpop.f32.mrb[0].mxu1 }
 0x1eb   : > { %v582_v56 = vmul.f32 %v500_v55, %v500_v55  ;;  %v1135_v57 = vpop.f32.mrb[1].mxu1 }
 0x1ec   : > { %v578_v58 = vpop.f32.mrb[8].mxu0 }
 0x1ed   : > { %v583_v59 = vsub.f32 %v578_v58, %v582_v56  ;;  %v1154_v60 = vpop.f32.mrb[9].mxu0 }
 0x1ef   : > { %v584_v61 = vadd.f32 1e-05, %v583_v59 }
 0x1f1   : > { %1297 = vrsqrt.f32 %v584_v61 }
 0x1fb   : > { %v1298_v62 = vpop.eup %1297 }
 0x1fc   : > { %1155 = vmatprep.subr.mxu1 %v1298_v62  ;;  %v724_v0 = vmul.f32 %v1298_v62, %v500_v55 }
 0x1fd   : > { %1156 = vmatpush3.msra.mxu1 %v1298_v62 }
 0x1fe   : > { %1158 = vmatmul.mubr.msk.f32.vlgmr.msra.gmra.mrb[2].mxu1 %vm594_vm3, %v587_v63  ;;  %1169 = vmatprep.subr.mxu0 %v724_v0 }
 0x1ff   : > { %1215 = vmatprep.subr.mxu1 %v724_v0  ;;  %1170 = vmatpush3.msra.mxu0 %v724_v0 }
 0x200   : > { %1216 = vmatpush3.msra.mxu1 %v724_v0  ;;  %1172 = vmatmul.mubr.msk.f32.vlgmr.msra.gmra.mrb[10].mxu0 %vm594_vm3, %v587_v63 }
 0x201   : > { %1160 = vmatprep.mubr.msk.f32.mxu1 %vm594_vm3, %v588_v1  ;;  %1174 = vmatprep.mubr.msk.f32.mxu0 %vm594_vm3, %v588_v1 }
 0x202   : > { %1161 = vmatmul.mubr.msk.f32.gmra.mrb[4].mxu1 %vm594_vm3, %v589_v2 }
 0x203   : > { %1163 = vmatprep.mubr.msk.f32.mxu1 %vm594_vm3, %v590_v3 }
 0x204   : > { %1175 = vmatmul.mubr.msk.f32.gmra.mrb[12].mxu0 %vm594_vm3, %v589_v2 }
 0x205   : > { %1177 = vmatprep.mubr.msk.f32.mxu0 %vm594_vm3, %v590_v3 }
 0x206   : > { %1164 = vmatmul.mubr.msk.f32.gmra.mrb[6].mxu1 %vm594_vm3, %v591_v4 }
 0x207   : > { %1166 = vmatprep.mubr.msk.f32.mxu1 %vm594_vm3, %v592_v5 }
 0x208   : > { %1178 = vmatmul.mubr.msk.f32.gmra.mrb[14].mxu0 %vm594_vm3, %v591_v4 }
 0x20a   : > { %1167 = vmatmul.mubr.msk.f32.gmra.mrb[8].mxu1 %vm594_vm3, %v593_v6 }
 0x20b   : > { %1180 = vmatprep.mubr.msk.f32.mxu1 %vm594_vm3, %v592_v5 }
 0x20e   : > { %1181 = vmatmul.mubr.msk.f32.vlgmr.msra.gmra.mrb[10].mxu1 %vm594_vm3, %v593_v6 }
 0x2d1   : > { %v1159_v9 = vpop.f32.mrb[2].mxu1 }
 0x2d2   : > { %v831_v10 = vmul.f32 %v1159_v9, %v1554_v20  ;;  %v685_v11 = vpop.f32.mrb[3].mxu1 }
 0x2d3   : > { %v830_v12 = vmul.f32 %v685_v11, %v1558_v22  ;;  %v1173_v13 = vpop.f32.mrb[10].mxu0 }
 0x2d4   : > { %v839_v14 = vsub.f32 %v831_v10, %v1173_v13  ;;  %v791_v15 = vpop.f32.mrb[11].mxu0 }
 0x2d5   : > { %v838_v17 = vsub.f32 %v830_v12, %v791_v15  ;;  %v1162_v18 = vpop.f32.mrb[4].mxu1 }
 0x2d6   : > { %v895_v19 = vadd.f32 %v862_v16, %v839_v14  ;;  %v833_v21 = vmul.f32 %v1162_v18, %v1564_v26  ;;  %v695_v23 = vpop.f32.mrb[5].mxu1 }
 0x2d7   : > { %v894_v25 = vadd.f32 %v857_v7, %v838_v17  ;;  %v832_v27 = vmul.f32 %v695_v23, %v1568_v28  ;;  %v1176_v29 = vpop.f32.mrb[12].mxu0 }
 0x2d8   : > { %903 = vst [vmem:[%s1666_s30 + $0x8] sm:$0xff] %v895_v19  ;;  %v841_v20 = vsub.f32 %v833_v21, %v1176_v29  ;;  %v801_v22 = vpop.f32.mrb[13].mxu0 }
 0x2d9   : > { %902 = vst [vmem:[%s1666_s30] sm:$0xff] %v894_v25  ;;  %v840_v30 = vsub.f32 %v832_v27, %v801_v22  ;;  %v1165_v31 = vpop.f32.mrb[6].mxu1 }
 0x2da   : > { %v897_v26 = vadd.f32 %v872_v24, %v841_v20  ;;  %v835_v33 = vmul.f32 %v1165_v31, %v1574_v32  ;;  %v705_v35 = vpop.f32.mrb[7].mxu1 }
 0x2db   : > { %v896_v36 = vadd.f32 %v867_v8, %v840_v30  ;;  %v834_v28 = vmul.f32 %v705_v35, %v1578_v34  ;;  %v1179_v37 = vpop.f32.mrb[14].mxu0 }
 0x2dc   : > { %905 = vst [vmem:[%s1666_s30 + $0x18] sm:$0xff] %v897_v26  ;;  %v843_v39 = vsub.f32 %v835_v33, %v1179_v37  ;;  %v811_v41 = vpop.f32.mrb[15].mxu0 }
 0x2dd   : > { %904 = vst [vmem:[%s1666_s30 + $0x10] sm:$0xff] %v896_v36  ;;  %v842_v43 = vsub.f32 %v834_v28, %v811_v41  ;;  %v1168_v44 = vpop.f32.mrb[8].mxu1 }
 0x2de   : > { %v899_v46 = vadd.f32 %v882_v42, %v843_v39  ;;  %v837_v32 = vmul.f32 %v1168_v44, %v1584_v38  ;;  %v715_v47 = vpop.f32.mrb[9].mxu1  ;;  %v892_v38 = vpop.permute.xlu1 %891 }
 0x2df   : > { %v898_v48 = vadd.f32 %v877_v45, %v842_v43  ;;  %v836_v34 = vmul.f32 %v715_v47, %v1588_v40 }
 0x2e0   : > { %907 = vst [vmem:[%s1666_s30 + $0x28] sm:$0xff] %v899_v46 }
 0x2e1   : > { %906 = vst [vmem:[%s1666_s30 + $0x20] sm:$0xff] %v898_v48  ;;  %v1182_v49 = vpop.f32.mrb[10].mxu1 }
 0x2e2   : > { %v845_v50 = vsub.f32 %v837_v32, %v1182_v49  ;;  %v821_v51 = vpop.f32.mrb[11].mxu1 }
 0x2e3   : > { %v844_v52 = vsub.f32 %v836_v34, %v821_v51 }
 0x2e4   : > { %v901_v54 = vadd.f32 %v892_v38, %v845_v50 }
 0x2e5   : > { %v900_v40 = vadd.f32 %v887_v53, %v844_v52 }
 0x2e6   : > { %909 = vst [vmem:[%s1666_s30 + $0x38] sm:$0xff] %v901_v54 }
 0x2e7   : > { %908 = vst [vmem:[%s1666_s30 + $0x30] sm:$0xff] %v900_v40 }
 0x2e8   : > { %1312 = shalt.err (!%p1309_p7)
}
 0x2e9   : > { %s1313_s30 = scalar_lea.hbm %s1686_s14, 1024  ;;  %s1317_s11 = scalar_lea.hbm %s1747_s5, 4096 }
 0x2ea   : > { %p1314_p10 = scmp.ne.s32.totalorder %s1686_s14, %s1313_s30  ;;  %p1318_p13 = scmp.lt.u32.totalorder %s1686_s14, %s1747_s5 }
 0x2eb   : > { %p1319_p0 = scmp.lt.u32.totalorder %s1317_s11, %s1313_s30  ;;  %p1321_p2 = scmp.lt.u32.totalorder %s1313_s30, %s1686_s14 }
 0x2ec   : > { %p1315_p11 = pnand %p1314_p10, %p1493_p8 }
 0x2ed   : > { %p1320_p1 = por %p1319_p0, %p1318_p13 }
 0x2ee   : > { %p1316_p12 = pneg %p1315_p11 }
 0x2ef   : > { %p1322_p3 = por %p1321_p2, %p1320_p1 }
 0x2f1   : > { %p1323_p4 = pnand %p1322_p3, %p1316_p12 }
 0x2f3   : > { %1326 = shalt.err (!%p1323_p4)
}
 0x2f4   : > { %s1400_s16 = smov 128   ;;  %s1401_s17 = smov 256  }
 0x2f5   : > { %s1402_s26 = smov 8  }
 0x2f6   : > { %1217 = dma.vmem_to_hbm [thread:$0]  (%p1493_p8), %s1681_s22, 1024, %s1686_s14, %s911_s15, %s1400_s16, %s1401_s17, %s1402_s26  }
 0x2f7 PF: > { %p1223_p5 = scmp.ge.s32.totalorder %s1393_s25, 2  ;;  %s940_s27 = sand.u32 1, %s1365_s18  }
 0x2f8   : > { %s941_s30 = scalar_lea.sflag [#allocation4], %s940_s27 }
 0x2f9   : > { %p1220_p6 = pnand %p1223_p5, %p1497_p9 }
 0x2fb   : > { %1360 = dma.done.wait (!%p1220_p6), %s941_s30, 1024  }
 0x2fc   : > { %1362 = vsyncadd (!%p1220_p6), %s941_s30, 4294966272  ;;  %s18_s25 = sadd.s32 1, %s1393_s25   ;;  %s1751_s18 = smov %s1369_s19 }
 0x2fd   : > { %p15_p7 = scmp.ge.s32.totalorder %s18_s25, 6   ;;  %s1752_s19 = smov %s1373_s20 }
 0x2fe   : > { %s1753_s20 = smov %s1505_s12  ;;  %s1754_s21 = smov %s1385_s23 }
 0x2ff   : > { %s1755_s22 = smov %s1389_s24  ;;  %s1756_s23 = smov %s1759_s28 }
 0x300   : > { %s1757_s24 = smov %s1763_s29  ;;  %17 = sbr.rel (!%p15_p7) target bundleno = 5 (0x5), region = 118 }
 0x307   :  { %946 = vsyncpa [#allocation4], 1 }
 0x308   :  { %948 = vsyncpa [#allocation4 + $0x1], 1 }

</bundles_post_ra>
